<compile_context>
chip_gen: v5e
topology: v5e:2x2
jax: 0.10.0
libtpu: 0.0.40
codegen_flags: <defaults>
</compile_context>

<pallas_src>
import math
import functools

import jax
import jax.numpy as jnp
from jax.experimental import pallas as pl
from jax.experimental.pallas import tpu as pltpu

HIDDEN = 128
LANE = 128            # TPU lane width: pad the action (output) dim to this
DEFAULT_TILE_B = 256  # batch tile; sweep 128-512 per generation, 256 is a solid default


def _round_up(x, m):
    return ((x + m - 1) // m) * m


def dqn_kernel(x_ref, w1_ref, b1_ref, w2_ref, b2_ref, w3_ref, b3_ref, o_ref):
    # x tile: (TILE_B, n_obs) bf16; weights bf16 (VMEM-resident across grid steps);
    # biases f32. MXU matmuls accumulate in f32; activations are re-cast to bf16
    # between layers to keep vreg pressure low at large TILE_B.
    x = x_ref[...]
    h1 = jnp.dot(x, w1_ref[...], preferred_element_type=jnp.float32) + b1_ref[...]
    h1 = jnp.maximum(h1, 0.0).astype(jnp.bfloat16)
    h2 = jnp.dot(h1, w2_ref[...], preferred_element_type=jnp.float32) + b2_ref[...]
    h2 = jnp.maximum(h2, 0.0).astype(jnp.bfloat16)
    out = jnp.dot(h2, w3_ref[...], preferred_element_type=jnp.float32) + b3_ref[...]
    o_ref[...] = out.astype(o_ref.dtype)


@functools.partial(jax.jit, static_argnames=("n_actions", "tile_b"))
def dqn_forward(x, params, n_actions, tile_b=DEFAULT_TILE_B):
    """x: (B, n_observations) float. params from init_dqn_params.
    Returns (B, n_actions) float32 Q-values."""
    B, n_obs = x.shape
    n_out_pad = params["w3"].shape[1]  # lane-padded action dim (multiple of 128)

    # Batch tiling: pad B up to a multiple of the effective tile (>= 8 sublanes).
    tile_b_eff = min(tile_b, _round_up(B, 8))
    b_pad = _round_up(B, tile_b_eff)
    x_p = jnp.pad(x, ((0, b_pad - B), (0, 0))).astype(jnp.bfloat16)

    grid = (b_pad // tile_b_eff,)
    const = lambda i: (0, 0)  # weights/biases stay resident (same block every step)

    flops = 2 * b_pad * (n_obs * HIDDEN + HIDDEN * HIDDEN + HIDDEN * n_out_pad)
    bytes_accessed = (
        x_p.size * 2
        + sum(int(params[k].size) * params[k].dtype.itemsize
              for k in ("w1", "b1", "w2", "b2", "w3", "b3"))
        + b_pad * n_out_pad * 4
    )

    out = pl.pallas_call(
        dqn_kernel,
        out_shape=jax.ShapeDtypeStruct((b_pad, n_out_pad), jnp.float32),
        grid_spec=pltpu.PrefetchScalarGridSpec(
            num_scalar_prefetch=0,
            grid=grid,
            in_specs=[
                pl.BlockSpec((tile_b_eff, n_obs), lambda i: (i, 0)),  # x streams
                pl.BlockSpec((n_obs, HIDDEN), const),
                pl.BlockSpec((1, HIDDEN), const),
                pl.BlockSpec((HIDDEN, HIDDEN), const),
                pl.BlockSpec((1, HIDDEN), const),
                pl.BlockSpec((HIDDEN, n_out_pad), const),
                pl.BlockSpec((1, n_out_pad), const),
            ],
            out_specs=pl.BlockSpec((tile_b_eff, n_out_pad), lambda i: (i, 0)),
        ),
        compiler_params=pltpu.CompilerParams(
            dimension_semantics=("parallel",),  # shards batch tiles across v7x's 2 TCs
        ),
        cost_estimate=pl.CostEstimate(
            flops=flops, transcendentals=0, bytes_accessed=bytes_accessed),
    )(
        x_p,
        params["w1"], params["b1"],
        params["w2"], params["b2"],
        params["w3"], params["b3"],
    )
    return out[:B, :n_actions]


def init_dqn_params(key, n_observations, n_actions):
    """PyTorch nn.Linear-style init: U(-1/sqrt(fan_in), 1/sqrt(fan_in)).
    Weights stored as (in_features, out_features) in bf16; biases (1, out) in f32.
    Layer-3 weight/bias are zero-padded on the output (lane) dim to a multiple of 128."""
    ks = jax.random.split(key, 6)
    n_out_pad = _round_up(n_actions, LANE)

    def linear(kw, kb, fan_in, fan_out, pad_to=None):
        bound = 1.0 / math.sqrt(fan_in)
        w = jax.random.uniform(kw, (fan_in, fan_out), jnp.float32, -bound, bound)
        b = jax.random.uniform(kb, (1, fan_out), jnp.float32, -bound, bound)
        if pad_to is not None and pad_to > fan_out:
            w = jnp.pad(w, ((0, 0), (0, pad_to - fan_out)))
            b = jnp.pad(b, ((0, 0), (0, pad_to - fan_out)))
        return w.astype(jnp.bfloat16), b  # bf16 weights, f32 biases

    w1, b1 = linear(ks[0], ks[1], n_observations, HIDDEN)
    w2, b2 = linear(ks[2], ks[3], HIDDEN, HIDDEN)
    w3, b3 = linear(ks[4], ks[5], HIDDEN, n_actions, pad_to=n_out_pad)
    return {"w1": w1, "b1": b1, "w2": w2, "b2": b2, "w3": w3, "b3": b3}


def dqn_reference(x, params, n_actions):
    w1 = params["w1"].astype(jnp.float32)
    w2 = params["w2"].astype(jnp.float32)
    w3 = params["w3"].astype(jnp.float32)[:, :n_actions]
    b3 = params["b3"][:, :n_actions]
    h1 = jnp.maximum(x @ w1 + params["b1"], 0.0)
    h2 = jnp.maximum(h1 @ w2 + params["b2"], 0.0)
    return h2 @ w3 + b3


if __name__ == "__main__":
    B = 2
    n_observations = 32
    n_actions = 8

    key = jax.random.PRNGKey(0)
    k_param, k_x = jax.random.split(key)
    params = init_dqn_params(k_param, n_observations, n_actions)
    x = jax.random.normal(k_x, (B, n_observations), jnp.float32)

    out = dqn_forward(x, params, n_actions)
    out = jax.block_until_ready(out)

    ref = dqn_reference(x, params, n_actions)
    assert out.shape == (B, n_actions), out.shape
    # bf16 inputs/activations (f32 accumulation) vs. f32 reference -> loose tolerance.
    assert jnp.allclose(out, ref, atol=2e-2, rtol=2e-2), float(jnp.max(jnp.abs(out - ref)))

    print("KERNEL_OK")
</pallas_src>

<mosaic_0001>
module attributes {stable_mosaic.version = 11 : i64} {
  func.func @dqn_kernel(%arg0: i32, %arg1: memref<8x32xbf16, #tpu.memory_space<vmem>>, %arg2: memref<32x128xbf16, #tpu.memory_space<vmem>>, %arg3: memref<1x128xf32, #tpu.memory_space<vmem>>, %arg4: memref<128x128xbf16, #tpu.memory_space<vmem>>, %arg5: memref<1x128xf32, #tpu.memory_space<vmem>>, %arg6: memref<128x128xbf16, #tpu.memory_space<vmem>>, %arg7: memref<1x128xf32, #tpu.memory_space<vmem>>, %arg8: memref<8x128xf32, #tpu.memory_space<vmem>>) attributes {dimension_semantics = [#tpu.dimension_semantics<parallel>], iteration_bounds = array<i64: 1>, scalar_prefetch = 0 : i64, scratch_operands = 0 : i64, tpu.core_type = #tpu.core_type<tc>, window_params = [{transform_indices = @transform_0, window_bounds = array<i64: 8, 32>}, {pipeline_mode = #tpu.pipeline_mode<synchronous>, transform_indices = @transform_1, window_bounds = array<i64: 32, 128>}, {pipeline_mode = #tpu.pipeline_mode<synchronous>, transform_indices = @transform_2, window_bounds = array<i64: 1, 128>}, {pipeline_mode = #tpu.pipeline_mode<synchronous>, transform_indices = @transform_3, window_bounds = array<i64: 128, 128>}, {pipeline_mode = #tpu.pipeline_mode<synchronous>, transform_indices = @transform_4, window_bounds = array<i64: 1, 128>}, {pipeline_mode = #tpu.pipeline_mode<synchronous>, transform_indices = @transform_5, window_bounds = array<i64: 128, 128>}, {pipeline_mode = #tpu.pipeline_mode<synchronous>, transform_indices = @transform_6, window_bounds = array<i64: 1, 128>}, {transform_indices = @transform_7, window_bounds = array<i64: 8, 128>}]} {
    %c0 = arith.constant 0 : index
    %c0_0 = arith.constant 0 : index
    %0 = vector.load %arg1[%c0, %c0_0] : memref<8x32xbf16, #tpu.memory_space<vmem>>, vector<8x32xbf16>
    %c0_1 = arith.constant 0 : index
    %c0_2 = arith.constant 0 : index
    %1 = vector.load %arg2[%c0_1, %c0_2] : memref<32x128xbf16, #tpu.memory_space<vmem>>, vector<32x128xbf16>
    %cst = arith.constant dense<0.000000e+00> : vector<8x128xf32>
    %2 = tpu.matmul %0, %1, %cst {dimension_numbers = #tpu.dot_dimension_numbers<[1], [0], [0], [1], [0, 0, 1, 1], [], []>} : vector<8x32xbf16>, vector<32x128xbf16>, vector<8x128xf32> -> vector<8x128xf32>
    %c0_3 = arith.constant 0 : index
    %c0_4 = arith.constant 0 : index
    %3 = vector.load %arg3[%c0_3, %c0_4] : memref<1x128xf32, #tpu.memory_space<vmem>>, vector<1x128xf32>
    %4 = vector.broadcast %3 : vector<1x128xf32> to vector<8x128xf32>
    %5 = arith.addf %2, %4 : vector<8x128xf32>
    %cst_5 = arith.constant 0.000000e+00 : f32
    %6 = vector.broadcast %cst_5 : f32 to vector<8x128xf32>
    %7 = arith.maximumf %5, %6 : vector<8x128xf32>
    %8 = arith.truncf %7 : vector<8x128xf32> to vector<8x128xbf16>
    %c0_6 = arith.constant 0 : index
    %c0_7 = arith.constant 0 : index
    %9 = vector.load %arg4[%c0_6, %c0_7] : memref<128x128xbf16, #tpu.memory_space<vmem>>, vector<128x128xbf16>
    %cst_8 = arith.constant dense<0.000000e+00> : vector<8x128xf32>
    %10 = tpu.matmul %8, %9, %cst_8 {dimension_numbers = #tpu.dot_dimension_numbers<[1], [0], [0], [1], [0, 0, 1, 1], [], []>} : vector<8x128xbf16>, vector<128x128xbf16>, vector<8x128xf32> -> vector<8x128xf32>
    %c0_9 = arith.constant 0 : index
    %c0_10 = arith.constant 0 : index
    %11 = vector.load %arg5[%c0_9, %c0_10] : memref<1x128xf32, #tpu.memory_space<vmem>>, vector<1x128xf32>
    %12 = vector.broadcast %11 : vector<1x128xf32> to vector<8x128xf32>
    %13 = arith.addf %10, %12 : vector<8x128xf32>
    %cst_11 = arith.constant 0.000000e+00 : f32
    %14 = vector.broadcast %cst_11 : f32 to vector<8x128xf32>
    %15 = arith.maximumf %13, %14 : vector<8x128xf32>
    %16 = arith.truncf %15 : vector<8x128xf32> to vector<8x128xbf16>
    %c0_12 = arith.constant 0 : index
    %c0_13 = arith.constant 0 : index
    %17 = vector.load %arg6[%c0_12, %c0_13] : memref<128x128xbf16, #tpu.memory_space<vmem>>, vector<128x128xbf16>
    %cst_14 = arith.constant dense<0.000000e+00> : vector<8x128xf32>
    %18 = tpu.matmul %16, %17, %cst_14 {dimension_numbers = #tpu.dot_dimension_numbers<[1], [0], [0], [1], [0, 0, 1, 1], [], []>} : vector<8x128xbf16>, vector<128x128xbf16>, vector<8x128xf32> -> vector<8x128xf32>
    %c0_15 = arith.constant 0 : index
    %c0_16 = arith.constant 0 : index
    %19 = vector.load %arg7[%c0_15, %c0_16] : memref<1x128xf32, #tpu.memory_space<vmem>>, vector<1x128xf32>
    %20 = vector.broadcast %19 : vector<1x128xf32> to vector<8x128xf32>
    %21 = arith.addf %18, %20 : vector<8x128xf32>
    %c0_17 = arith.constant 0 : index
    %c0_18 = arith.constant 0 : index
    %22 = vector.load %arg8[%c0_17, %c0_18] : memref<8x128xf32, #tpu.memory_space<vmem>>, vector<8x128xf32>
    tpu.vector_store %arg8[%c0_17, %c0_18], %21 {strides = array<i32>} : memref<8x128xf32, #tpu.memory_space<vmem>>, vector<8x128xf32>,
    return
  }
  func.func @transform_0(%arg0: i32) -> (i32, i32) {
    %c0_i32 = arith.constant 0 : i32
    %c0_i32_0 = arith.constant 0 : i32
    return %arg0, %c0_i32 : i32, i32
  }
  func.func @transform_1(%arg0: i32) -> (i32, i32) {
    %c0_i32 = arith.constant 0 : i32
    %c0_i32_0 = arith.constant 0 : i32
    %c0_i32_1 = arith.constant 0 : i32
    return %c0_i32, %c0_i32_0 : i32, i32
  }
  func.func @transform_2(%arg0: i32) -> (i32, i32) {
    %c0_i32 = arith.constant 0 : i32
    %c0_i32_0 = arith.constant 0 : i32
    %c0_i32_1 = arith.constant 0 : i32
    return %c0_i32, %c0_i32_0 : i32, i32
  }
  func.func @transform_3(%arg0: i32) -> (i32, i32) {
    %c0_i32 = arith.constant 0 : i32
    %c0_i32_0 = arith.constant 0 : i32
    %c0_i32_1 = arith.constant 0 : i32
    return %c0_i32, %c0_i32_0 : i32, i32
  }
  func.func @transform_4(%arg0: i32) -> (i32, i32) {
    %c0_i32 = arith.constant 0 : i32
    %c0_i32_0 = arith.constant 0 : i32
    %c0_i32_1 = arith.constant 0 : i32
    return %c0_i32, %c0_i32_0 : i32, i32
  }
  func.func @transform_5(%arg0: i32) -> (i32, i32) {
    %c0_i32 = arith.constant 0 : i32
    %c0_i32_0 = arith.constant 0 : i32
    %c0_i32_1 = arith.constant 0 : i32
    return %c0_i32, %c0_i32_0 : i32, i32
  }
  func.func @transform_6(%arg0: i32) -> (i32, i32) {
    %c0_i32 = arith.constant 0 : i32
    %c0_i32_0 = arith.constant 0 : i32
    %c0_i32_1 = arith.constant 0 : i32
    return %c0_i32, %c0_i32_0 : i32, i32
  }
  func.func @transform_7(%arg0: i32) -> (i32, i32) {
    %c0_i32 = arith.constant 0 : i32
    %c0_i32_0 = arith.constant 0 : i32
    return %arg0, %c0_i32 : i32, i32
  }
}

</mosaic_0001>

<bundles_post_ra>
// kernel: dqn_forward.1
= control target key start
LH: loop header
LB: loop body
LE: loop exit
PB: predicated region body
PF: predicated region fallthrough
CT: control target
= control target key end

     0   :  { %12 = vsyncpa [#allocation3], 0  ;;  %s529_s0 = inlined_call_operand.vmem [shape: bf16[8,32], index: 0, kind: input, shape index: {}]   ;;  %s530_s1 = inlined_call_operand.hbm [shape: bf16[32,128], index: 1, kind: input, shape index: {}]   ;;  %s531_s2 = inlined_call_operand.vmem [shape: f32[1,128], index: 2, kind: input, shape index: {}]   ;;  %s532_s3 = inlined_call_operand.hbm [shape: bf16[128,128], index: 3, kind: input, shape index: {}]   ;;  %s533_s4 = inlined_call_operand.vmem [shape: f32[1,128], index: 4, kind: input, shape index: {}]   ;;  %s534_s5 = inlined_call_operand.hbm [shape: bf16[128,128], index: 5, kind: input, shape index: {}]   ;;  %s535_s6 = inlined_call_operand.vmem [shape: f32[1,128], index: 6, kind: input, shape index: {}]   ;;  %s536_s7 = inlined_call_operand.vmem [shape: f32[8,128], index: 7, kind: output, shape index: {}]  }
   0x1   :  { %13 = vsyncpa [#allocation5], 0  ;;  %s35_s26 = sshll.u32 %s532_s3, 4  ;;  %s460_s27 = smov [#allocation4]   ;;  %s36_s26 = int_to_ptr.hbm [resolvable:$true] %s35_s26 }
   0x2   :  { %s37_s28 = sshll.u32 %s460_s27, 4  ;;  %s20_s8 = sshll.u32 %s530_s1, 4  ;;  %s38_s28 = int_to_ptr.vmem [resolvable:$true] %s37_s28  ;;  %s21_s8 = int_to_ptr.hbm [resolvable:$true] %s20_s8 }
   0x3   :  { %s461_s9 = smov 64   ;;  %s462_s10 = smov 4  }
   0x4   :  { %43 = dma.hbm_to_vmem [thread:$0]  %s36_s26, 1024, %s38_s28, [#allocation5], %s461_s9, %s461_s9, %s462_s10  }
   0x5   :  { %s463_s11 = smov [#allocation2]   ;;  %s50_s15 = sshll.u32 %s534_s5, 4  ;;  %s51_s15 = int_to_ptr.hbm [resolvable:$true] %s50_s15 }
   0x6   :  { %s22_s12 = sshll.u32 %s463_s11, 4  ;;  %s464_s3 = smov [#allocation6]   ;;  %s23_s12 = int_to_ptr.vmem [resolvable:$true] %s22_s12 }
   0x7   :  { %28 = dma.hbm_to_vmem [thread:$0]  %s21_s8, 256, %s23_s12, [#allocation3], %s461_s9, %s461_s9, %s462_s10  }
   0x8   :  { %s52_s16 = sshll.u32 %s464_s3, 4  ;;  %s53_s16 = int_to_ptr.vmem [resolvable:$true] %s52_s16 }
   0x9   :  { %58 = dma.hbm_to_vmem [thread:$0]  %s51_s15, 1024, %s53_s16, [#allocation5], %s461_s9, %s461_s9, %s462_s10  }
   0xa   :  { %456 = dma.done.wait [#allocation3], 256  }
   0xb   :  { %457 = vsyncadd [#allocation3], 4294967040 }
   0xc   :  { %458 = dma.done.wait [#allocation5], 2048  }
   0xd   :  { %459 = vsyncadd [#allocation5], 4294965248  ;;  %v359_v0 = vld [vmem:[#allocation2 + $0x8] sm:$0xff]  ;;  %v358_v2 = vld [vmem:[#allocation2] sm:$0xff]  ;;  %vm95_vm0 = vcmask 261120  }
   0xe   :  { %v367_v1 = vld [vmem:[#allocation4 + $0x38] sm:$0xff]  ;;  %105 = vmatpush.bf16.msra.mxu0 %v359_v0  ;;  %v366_v3 = vld [vmem:[#allocation4 + $0x30] sm:$0xff]  ;;  %v365_v5 = vld [vmem:[#allocation4 + $0x28] sm:$0xff] }
   0xf   :  { %182 = vmatpush.bf16.msra.mxu1 %v367_v1  ;;  %v74_v4 = vld [vmem:[%s529_s0] sm:$0xf]  ;;  %v364_v6 = vld [vmem:[#allocation4 + $0x20] sm:$0xff]  ;;  %v363_v7 = vld [vmem:[#allocation4 + $0x18] sm:$0xff] }
  0x10   :  { %v362_v8 = vld [vmem:[#allocation4 + $0x10] sm:$0xff]  ;;  %v361_v9 = vld [vmem:[#allocation4 + $0x8] sm:$0xff]  ;;  %v360_v10 = vld [vmem:[#allocation4] sm:$0xff] }
  0x11   :  { %v375_v11 = vld [vmem:[#allocation6 + $0x38] sm:$0xff]  ;;  %v374_v12 = vld [vmem:[#allocation6 + $0x30] sm:$0xff]  ;;  %v373_v13 = vld [vmem:[#allocation6 + $0x28] sm:$0xff] }
  0x12   :  { %106 = vmatpush.bf16.msra.mxu0 %v358_v2  ;;  %265 = vmatpush.bf16.msra.mxu2 %v375_v11  ;;  %v372_v14 = vld [vmem:[#allocation6 + $0x20] sm:$0xff]  ;;  %v371_v15 = vld [vmem:[#allocation6 + $0x18] sm:$0xff]  ;;  %v370_v16 = vld [vmem:[#allocation6 + $0x10] sm:$0xff] }
  0x13   :  { %183 = vmatpush.bf16.msra.mxu1 %v366_v3  ;;  %v381_v17 = vld [vmem:[%s531_s2] ss:$0 sm:$0xff]  ;;  %v369_v23 = vld [vmem:[#allocation6 + $0x8] sm:$0xff]  ;;  %v368_v24 = vld [vmem:[#allocation6] sm:$0xff] }
  0x14   :  { %v382_v25 = vld [vmem:[%s533_s4] ss:$0 sm:$0xff] }
  0x15   :  { %293 = vmatmul.msk.bf16.vlgmr.msra.gmra.mxu0 %vm95_vm0, %v74_v4  ;;  %v383_v31 = vld [vmem:[%s535_s6] ss:$0 sm:$0xff] }
  0x16   :  { %266 = vmatpush.bf16.msra.mxu2 %v374_v12 }
  0x17   :  { %184 = vmatpush.bf16.msra.mxu1 %v365_v5 }
  0x1a   :  { %267 = vmatpush.bf16.msra.mxu2 %v373_v13 }
  0x1b   :  { %185 = vmatpush.bf16.msra.mxu1 %v364_v6 }
  0x1e   :  { %268 = vmatpush.bf16.msra.mxu2 %v372_v14 }
  0x1f   :  { %186 = vmatpush.bf16.msra.mxu1 %v363_v7 }
  0x22   :  { %269 = vmatpush.bf16.msra.mxu2 %v371_v15 }
  0x23   :  { %187 = vmatpush.bf16.msra.mxu1 %v362_v8 }
  0x26   :  { %270 = vmatpush.bf16.msra.mxu2 %v370_v16 }
  0x27   :  { %188 = vmatpush.bf16.msra.mxu1 %v361_v9 }
  0x2a   :  { %271 = vmatpush.bf16.msra.mxu2 %v369_v23 }
  0x2b   :  { %189 = vmatpush.bf16.msra.mxu1 %v360_v10 }
  0x2e   :  { %272 = vmatpush.bf16.msra.mxu2 %v368_v24 }
  0x92   :  { %v108_v18 = vpop.f32.mrf.mxu0 }
  0x93   :  { %v109_v19 = vadd.f32 %v381_v17, %v108_v18 }
  0x95   :  { %v112_v20 = vmax.f32 %v109_v19, 0.0 }
  0x97   :  { %v113_v21 = vpack.c.bf16 %v112_v20, %v112_v20 }
  0x99   :  { %190 = vmatmul.bf16.vlgmr.msra.gmra.mxu1 %v113_v21 }
  0x9a   :  { %v110_v22 = vpop.f32.mrf.mxu0 }
 0x116   :  { %v191_v26 = vpop.f32.mrf.mxu1 }
 0x117   :  { %v192_v27 = vadd.f32 %v382_v25, %v191_v26 }
 0x119   :  { %v195_v28 = vmax.f32 %v192_v27, 0.0 }
 0x11b   :  { %v196_v29 = vpack.c.bf16 %v195_v28, %v195_v28 }
 0x11d   :  { %273 = vmatmul.bf16.vlgmr.msra.gmra.mxu2 %v196_v29 }
 0x11e   :  { %v193_v30 = vpop.f32.mrf.mxu1 }
 0x1a0   :  { %v274_v32 = vpop.f32.mrf.mxu2 }
 0x1a1   :  { %v275_v33 = vadd.f32 %v383_v31, %v274_v32 }
 0x1a3   :  { %278 = vst [vmem:[%s536_s7] sm:$0xff] %v275_v33 }
 0x1a8   :  { %v276_v34 = vpop.f32.mrf.mxu2 }
 0x1a9   :  { %283 = vsyncpa [#allocation3], 1 }
 0x1aa   :  { %284 = vsyncpa [#allocation5], 1 }

</bundles_post_ra>
